<compile_context>
chip_gen: v7x
topology: tpu7x:2x2x1
jax: 0.10.0
libtpu: 0.0.40
codegen_flags: <defaults>
</compile_context>

<pallas_src>
import jax
import jax.numpy as jnp
from jax import lax
from jax.experimental import pallas as pl
from jax.experimental.pallas import tpu as pltpu


def _linear_sigmoid_kernel(x_ref, w_ref, b_ref, o_ref):
    # x_ref: (TB, F) f32 VMEM    w_ref: (1, F) f32 VMEM (resident)
    # b_ref: (1, 1) f32 SMEM     o_ref: (1, 1, TB) f32 VMEM (lane-dense row)
    # (1,F) . (TB,F)^T -> (1, TB): contraction on the feature axis of both operands.
    logits = lax.dot_general(
        w_ref[...], x_ref[...],
        dimension_numbers=(((1,), (1,)), ((), ())),
        preferred_element_type=jnp.float32,
    )                                    # (1, TB)
    logits = logits + b_ref[0, 0]        # scalar bias from SMEM
    sig = 1.0 / (1.0 + jnp.exp(-logits))  # exact sigmoid (exp rides the EUP)
    o_ref[0] = sig.astype(o_ref.dtype)


def _round_up(x, m):
    return ((x + m - 1) // m) * m


def linear_binary_classifier_forward(x, weight, bias, *, max_block_batch=2048):
    """sigmoid(x @ weight.T + bias).

    x: (B, F) float;  weight: (1, F) (PyTorch nn.Linear(F, 1) layout);  bias: (1,).
    Returns (B, 1) float32, matching the PyTorch forward.
    """
    x = x.astype(jnp.float32)
    weight = weight.astype(jnp.float32).reshape(1, -1)   # keep (1, F): no padded lane-1 tile
    bias = bias.astype(jnp.float32).reshape(1, 1)
    B, F = x.shape

    # Batch tile: multiple of 128 (lane-dense output row, sublane-aligned x tile),
    # capped so one x buffer is <= ~4 MiB -> double-buffered pipeline fits the
    # default scoped VMEM on v5e/v6e/v7x without raising vmem_limit_bytes.
    bytes_per_row = F * 4
    tb_cap = max(128, (4 * 1024 * 1024 // bytes_per_row) // 128 * 128)
    TB = max(128, min(max_block_batch, tb_cap, _round_up(B, 128)))

    B_pad = _round_up(B, TB)
    if B_pad != B:
        x = jnp.pad(x, ((0, B_pad - B), (0, 0)))   # padded rows sliced off below
    num_tiles = B_pad // TB

    out = pl.pallas_call(
        _linear_sigmoid_kernel,
        out_shape=jax.ShapeDtypeStruct((num_tiles, 1, TB), jnp.float32),
        grid_spec=pltpu.PrefetchScalarGridSpec(
            num_scalar_prefetch=0,
            grid=(num_tiles,),
            in_specs=[
                pl.BlockSpec((TB, F), lambda i: (i, 0)),            # x: pipelined batch tiles
                pl.BlockSpec((1, F), lambda i: (0, 0)),             # weight: resident (1, F)
                pl.BlockSpec(memory_space=pltpu.MemorySpace.SMEM),  # bias: scalar in SMEM
            ],
            out_specs=pl.BlockSpec((1, 1, TB), lambda i: (i, 0, 0)),  # lane-dense output row
        ),
        compiler_params=pltpu.CompilerParams(
            # Independent batch tiles: lets the grid shard across TensorCores (2x on v7x).
            dimension_semantics=("parallel",),
        ),
    )(x, weight, bias)

    return out.reshape(B_pad, 1)[:B]


if __name__ == "__main__":
    key = jax.random.PRNGKey(0)
    kx, kw, kb = jax.random.split(key, 3)

    batch, n_features = 300, 32
    x = jax.random.normal(kx, (batch, n_features), dtype=jnp.float32)

    # Deterministic parameter init mimicking nn.Linear(n_features, 1):
    # U(-1/sqrt(fan_in), 1/sqrt(fan_in)) for both weight and bias.
    bound = 1.0 / jnp.sqrt(jnp.float32(n_features))
    weight = jax.random.uniform(kw, (1, n_features), jnp.float32, -bound, bound)
    bias = jax.random.uniform(kb, (1,), jnp.float32, -bound, bound)

    ref = jax.nn.sigmoid(x @ weight.T + bias)

    # Multi-tile / padded path: TB=128 -> 3 batch tiles, batch padded 300 -> 384.
    out = jax.block_until_ready(
        linear_binary_classifier_forward(x, weight, bias, max_block_batch=128))
    assert out.shape == (batch, 1)
    assert jnp.allclose(out, ref, atol=1e-5, rtol=1e-5)

    # Single-tile / default-config path (tiny batch).
    out_small = jax.block_until_ready(
        linear_binary_classifier_forward(x[:8], weight, bias))
    assert out_small.shape == (8, 1)
    assert jnp.allclose(out_small, ref[:8], atol=1e-5, rtol=1e-5)

    # TODO(synk): fit()/predict_proba() training loop (BCELoss, SGD, DataLoader) is
    # host-side training utility code, not part of the forward pass — not kernelized.
    print("KERNEL_OK")
</pallas_src>

<mosaic_0001>
module attributes {stable_mosaic.version = 11 : i64} {
  func.func @_linear_sigmoid_kernel(%arg0: i32, %arg1: memref<128x32xf32, #tpu.memory_space<vmem>>, %arg2: memref<1x32xf32, #tpu.memory_space<vmem>>, %arg3: memref<1x1xf32, #tpu.memory_space<smem>>, %arg4: memref<1x1x128xf32, #tpu.memory_space<vmem>>) attributes {dimension_semantics = [#tpu.dimension_semantics<parallel>], iteration_bounds = array<i64: 3>, scalar_prefetch = 0 : i64, scratch_operands = 0 : i64, tpu.core_type = #tpu.core_type<tc>, window_params = [{transform_indices = @transform_0, window_bounds = array<i64: 128, 32>}, {pipeline_mode = #tpu.pipeline_mode<synchronous>, transform_indices = @transform_1, window_bounds = array<i64: 1, 32>}, {transform_indices = @transform_2, window_bounds = array<i64: 1, 1>}, {transform_indices = @transform_3, window_bounds = array<i64: 1, 1, 128>}]} {
    %c0 = arith.constant 0 : index
    %c0_0 = arith.constant 0 : index
    %0 = vector.load %arg2[%c0, %c0_0] : memref<1x32xf32, #tpu.memory_space<vmem>>, vector<1x32xf32>
    %c0_1 = arith.constant 0 : index
    %c0_2 = arith.constant 0 : index
    %1 = vector.load %arg1[%c0_1, %c0_2] : memref<128x32xf32, #tpu.memory_space<vmem>>, vector<128x32xf32>
    %cst = arith.constant dense<0.000000e+00> : vector<1x128xf32>
    %2 = tpu.matmul %0, %1, %cst {dimension_numbers = #tpu.dot_dimension_numbers<[1], [1], [0], [0], [0, 0, 1, 0], [], []>} : vector<1x32xf32>, vector<128x32xf32>, vector<1x128xf32> -> vector<1x128xf32>
    %c0_3 = arith.constant 0 : index
    %c0_4 = arith.constant 0 : index
    %3 = memref.load %arg3[%c0_3, %c0_4] : memref<1x1xf32, #tpu.memory_space<smem>>
    %4 = vector.broadcast %3 : f32 to vector<1x128xf32>
    %5 = arith.addf %2, %4 : vector<1x128xf32>
    %cst_5 = arith.constant 0.000000e+00 : f32
    %6 = vector.broadcast %cst_5 : f32 to vector<1x128xf32>
    %7 = arith.subf %6, %5 : vector<1x128xf32>
    %8 = math.exp %7 : vector<1x128xf32>
    %cst_6 = arith.constant 1.000000e+00 : f32
    %9 = vector.broadcast %cst_6 : f32 to vector<1x128xf32>
    %10 = arith.addf %9, %8 : vector<1x128xf32>
    %cst_7 = arith.constant 1.000000e+00 : f32
    %11 = vector.broadcast %cst_7 : f32 to vector<1x128xf32>
    %12 = arith.divf %11, %10 : vector<1x128xf32>
    %c0_8 = arith.constant 0 : index
    %c0_9 = arith.constant 0 : index
    %c0_10 = arith.constant 0 : index
    %13 = vector.load %arg4[%c0_8, %c0_9, %c0_10] : memref<1x1x128xf32, #tpu.memory_space<vmem>>, vector<1x1x128xf32>
    %14 = vector.shape_cast %13 : vector<1x1x128xf32> to vector<1x128xf32>
    %15 = vector.shape_cast %12 : vector<1x128xf32> to vector<1x1x128xf32>
    tpu.vector_store %arg4[%c0_8, %c0_9, %c0_10], %15 {strides = array<i32>} : memref<1x1x128xf32, #tpu.memory_space<vmem>>, vector<1x1x128xf32>,
    return
  }
  func.func @transform_0(%arg0: i32) -> (i32, i32) {
    %c0_i32 = arith.constant 0 : i32
    %c0_i32_0 = arith.constant 0 : i32
    return %arg0, %c0_i32 : i32, i32
  }
  func.func @transform_1(%arg0: i32) -> (i32, i32) {
    %c0_i32 = arith.constant 0 : i32
    %c0_i32_0 = arith.constant 0 : i32
    %c0_i32_1 = arith.constant 0 : i32
    return %c0_i32, %c0_i32_0 : i32, i32
  }
  func.func @transform_2(%arg0: i32) -> (i32, i32) {
    %c0_i32 = arith.constant 0 : i32
    %c0_i32_0 = arith.constant 0 : i32
    %c0_i32_1 = arith.constant 0 : i32
    return %c0_i32, %c0_i32_0 : i32, i32
  }
  func.func @transform_3(%arg0: i32) -> (i32, i32, i32) {
    %c0_i32 = arith.constant 0 : i32
    %c0_i32_0 = arith.constant 0 : i32
    %c0_i32_1 = arith.constant 0 : i32
    return %arg0, %c0_i32, %c0_i32_0 : i32, i32, i32
  }
}

</mosaic_0001>

<bundles_post_ra>
// kernel: tpu_custom_call.1
= control target key start
LH: loop header
LB: loop body
LE: loop exit
PB: predicated region body
PF: predicated region fallthrough
CT: control target
= control target key end

     0   :  { %s777_s0 = inlined_call_operand.vmem [shape: f32[384,32], index: 0, kind: input, shape index: {}]   ;;  %s778_s1 = inlined_call_operand.vmem [shape: f32[1,32], index: 1, kind: input, shape index: {}]   ;;  %s779_s2 = inlined_call_operand.<no memory space> [shape: f32[1,1], index: 2, kind: input, shape index: {}]   ;;  %s780_s3 = inlined_call_operand.hbm [shape: f32[3,1,128], index: 3, kind: output, shape index: {}]  }
   0x1   :  { %8 = sst [smem:[#allocation2]] %s779_s2 }
   0x2   :  { %9 = vsyncpa [#allocation4], 0 }
   0x3   :  { %11 = vsyncpa [#allocation4 + $0x1], 0  ;;  %s634_s14 = smov 0   ;;  %s636_s15 = smov 0  }
   0x4   :  { %s638_s16 = smov 0   ;;  %s640_s17 = smov 0  }
   0x5 LB: > { %s386_s2 = sadd.s32 4294967295, %s605_s17   ;;  %s387_s18 = sadd.s32 4294967294, %s605_s17   ;;  %s605_s17 = sphi %s640_s17, %s788_s17   ;;  %s601_s16 = sphi %s638_s16, %s787_s16   ;;  %s597_s15 = sphi %s636_s15, %s786_s15   ;;  %s593_s14 = sphi %s634_s14, %s785_s14  }
   0x6   : > { %s657_s19 = sadd.s32 1, %s605_s17   ;;  %s92_s20 = sadd.s32 1, %s601_s16 }
   0x7   : > { %s89_s21 = ssub.s32 %s605_s17, %s657_s19  ;;  %p102_p0 = scmp.ne.s32.totalorder %s601_s16, %s597_s15 }
   0x8   : > { %p90_p1 = scmp.eq.s32.totalorder %s89_s21, 0  ;;  %p103_p2 = scmp.eq.s32.totalorder %s386_s2, 2 }
   0x9   : > { %p108_p3 = scmp.ne.s32.totalorder %s597_s15, %s593_s14  ;;  %p109_p4 = scmp.eq.s32.totalorder %s387_s18, 2 }
   0xa   : > { %s667_s22 = scalar_select %p90_p1, %s601_s16, %s92_s20  }
   0xb   : > { %p669_p5 = por %p103_p2, %p102_p0  ;;  %p673_p6 = por %p109_p4, %p108_p3 }
   0xc   : > { %p390_p7 = scmp.ge.s32.totalorder %s605_s17, 1  ;;  %p142_p8 = scmp.lt.s32.totalorder %s605_s17, 4 }
   0xe   : > { %p143_p9 = pnand %p390_p7, %p142_p8 }
   0xf   : > { %s679_s25 = sshll.u32 (!%p143_p9), %s386_s2, 4  ;;  %v607_v0 = vmov (!%p143_p9), 0.0|0.0   ;;  %vm608_vm0 = vmmov (!%p143_p9), 0   ;;  %v609_v1 = vmov (!%p143_p9), 0.0   ;;  %vm190_vm1 = vcmask (!%p143_p9), 261120   ;;  %s188_s6 = sld [smem:[#allocation2]] (!%p143_p9) }
  0x10   : > { %146 = sbr.rel (%p143_p9) target bundleno = 349 (0x15d), region = 32  ;;  %465 = vmatprep.subr.bf16.mxu0 (!%p143_p9), %v607_v0  ;;  %p166_p10 = scmp.lt.s32.totalorder (!%p143_p9), %s679_s25, 47  ;;  %462 = vmatprep.mubr.msk.f32.mxu0 (!%p143_p9), %vm608_vm0, %v609_v1  ;;  %vm692_vm2 = vmpackc.low (!%p143_p9), %vm190_vm1, %vm190_vm1  ;;  %v171_v27 = vld [vmem:[%s778_s1] sm:$0x1] (!%p143_p9) }
  0x11   : > { %s163_s7 = sand.u32 (!%p143_p9), 1, %s597_s15   ;;  %s735_s12 = scalar_lea.hbm (!%p143_p9), %s780_s3, %s679_s25 }
  0x12   : > { %s164_s8 = scalar_lea.vmem (!%p143_p9), [#allocation3], %s163_s7  ;;  %s320_s13 = scalar_lea.sflag (!%p143_p9), [#allocation4], %s163_s7 }
  0x13   : > { %s332_s9 = sshll.u32 (!%p143_p9), %s164_s8, 4  ;;  %s610_s18 = smov (!%p143_p9), [#allocation3]   ;;  %s737_s9 = int_to_ptr.vmem [resolvable:$true] %s332_s9 }
  0x14   : > { %s543_s2 = scalar_lea.vmem (!%p143_p9), %s737_s9, 16  ;;  %s547_s20 = sshll.u32 (!%p143_p9), %s610_s18, 4  ;;  %s548_s20 = int_to_ptr.vmem [resolvable:$false] %s547_s20 }
  0x15   : > { %v189_v28 = vstv (!%p143_p9), %s188_s6  ;;  %p544_p11 = scmp.ne.s32.totalorder (!%p143_p9), %s737_s9, %s543_s2  ;;  %s549_s21 = scalar_lea.vmem (!%p143_p9), %s548_s20, 32 }
  0x16   : > { %p550_p0 = scmp.lt.s32.totalorder (!%p143_p9), %s737_s9, %s548_s20  ;;  %p551_p1 = scmp.lt.s32.totalorder (!%p143_p9), %s549_s21, %s543_s2 }
  0x17   : > { %s167_s26 = scalar_select %p166_p10, %s679_s25, 47 }
  0x18   : > { %p545_p12 = pnand %p544_p11, %p669_p5  ;;  %p552_p2 = por %p551_p1, %p550_p0 }
  0x19   : > { %s392_s27 = sshll.u32 %s167_s26, 3 }
  0x1a   : > { %s686_s30 = scalar_lea.vmem %s777_s0, %s392_s27  ;;  %p546_p13 = pneg %p545_p12 }
  0x1b   : > { %v172_v2 = vld [vmem:[%s686_s30] sm:$0xff]  ;;  %v173_v3 = vld [vmem:[%s686_s30 + $0x8] sm:$0xff]  ;;  %v174_v6 = vld [vmem:[%s686_s30 + $0x10] sm:$0xff] }
  0x1c   : > { %v466_v5 = vpack.c.bf16 %v173_v3, %v172_v2  ;;  %v175_v7 = vld [vmem:[%s686_s30 + $0x18] sm:$0xff]  ;;  %v176_v9 = vld [vmem:[%s686_s30 + $0x20] sm:$0xff]  ;;  %v177_v10 = vld [vmem:[%s686_s30 + $0x28] sm:$0xff]  ;;  %p553_p3 = pnand %p552_p2, %p546_p13 }
  0x1d   : > { %v470_v8 = vpack.c.bf16 %v175_v7, %v174_v6  ;;  %v474_v11 = vpack.c.bf16 %v177_v10, %v176_v9  ;;  %v178_v12 = vld [vmem:[%s686_s30 + $0x30] sm:$0xff]  ;;  %v179_v13 = vld [vmem:[%s686_s30 + $0x38] sm:$0xff]  ;;  %v180_v15 = vld [vmem:[%s686_s30 + $0x40] sm:$0xff] }
  0x1e   : > { %468 = vmatpush3.bf16.xpose.msk.msra.mxu0 %vm692_vm2, %v466_v5  ;;  %v478_v14 = vpack.c.bf16 %v179_v13, %v178_v12  ;;  %v181_v16 = vld [vmem:[%s686_s30 + $0x48] sm:$0xff]  ;;  %v182_v18 = vld [vmem:[%s686_s30 + $0x50] sm:$0xff]  ;;  %v183_v19 = vld [vmem:[%s686_s30 + $0x58] sm:$0xff] }
  0x1f   : > { %469 = vmatprep.subr.bf16.mxu0 %v607_v0  ;;  %v482_v17 = vpack.c.bf16 %v181_v16, %v180_v15  ;;  %v486_v20 = vpack.c.bf16 %v183_v19, %v182_v18  ;;  %v184_v21 = vld [vmem:[%s686_s30 + $0x60] sm:$0xff]  ;;  %v185_v22 = vld [vmem:[%s686_s30 + $0x68] sm:$0xff]  ;;  %v186_v24 = vld [vmem:[%s686_s30 + $0x70] sm:$0xff] }
  0x20   : > { %v490_v23 = vpack.c.bf16 %v185_v22, %v184_v21  ;;  %v187_v25 = vld [vmem:[%s686_s30 + $0x78] sm:$0xff] }
  0x21   : > { %v494_v26 = vpack.c.bf16 %v187_v25, %v186_v24 }
  0x26   : > { %472 = vmatpush3.bf16.xpose.msk.msra.mxu0 %vm692_vm2, %v470_v8 }
  0x27   : > { %473 = vmatprep.subr.bf16.mxu0 %v607_v0 }
  0x2e   : > { %476 = vmatpush3.bf16.xpose.msk.msra.mxu0 %vm692_vm2, %v474_v11 }
  0x2f   : > { %477 = vmatprep.subr.bf16.mxu0 %v607_v0 }
  0x36   : > { %480 = vmatpush3.bf16.xpose.msk.msra.mxu0 %vm692_vm2, %v478_v14 }
  0x37   : > { %481 = vmatprep.subr.bf16.mxu0 %v607_v0 }
  0x3e   : > { %484 = vmatpush3.bf16.xpose.msk.msra.mxu0 %vm692_vm2, %v482_v17 }
  0x3f   : > { %485 = vmatprep.subr.bf16.mxu0 %v607_v0 }
  0x46   : > { %488 = vmatpush3.bf16.xpose.msk.msra.mxu0 %vm692_vm2, %v486_v20 }
  0x47   : > { %489 = vmatprep.subr.bf16.mxu0 %v607_v0 }
  0x4e   : > { %492 = vmatpush3.bf16.xpose.msk.msra.mxu0 %vm692_vm2, %v490_v23 }
  0x4f   : > { %493 = vmatprep.subr.bf16.mxu0 %v607_v0 }
  0x56   : > { %496 = vmatpush3.bf16.xpose.msk.msra.mxu0 %vm692_vm2, %v494_v26 }
  0x5d   : > { %463 = vmatmul.mubr.msk.f32.vlgmr.msra.gmra.mrb[0].mxu0 %vm190_vm1, %v171_v27 }
 0x130   : > { %v308_v29 = vpop.f32.mrb[0].mxu0 }
 0x131   : > { %v309_v30 = vadd.f32 %v308_v29, %v189_v28  ;;  %v464_v31 = vpop.f32.mrb[1].mxu0 }
 0x133   : > { %v312_v32 = vsub.f32 0.0, %v309_v30 }
 0x135   : > { %v313_v33 = vmul.f32 1.442695, %v312_v32 }
 0x137   : > { %539 = vpow2.f32 %v313_v33 }
 0x141   : > { %v540_v34 = vpop.eup %539 }
 0x142   : > { %v315_v35 = vadd.f32 1.0, %v540_v34 }
 0x144   : > { %541 = vrcp.f32 %v315_v35 }
 0x14e   : > { %v542_v36 = vpop.eup %541 }
 0x14f   : > { %318 = vst [vmem:[%s164_s8] sm:$0x1] %v542_v36 }
 0x150   : > { %556 = shalt.err (!%p553_p3)
}
 0x151   : > { %s557_s25 = scalar_lea.hbm %s735_s12, 16  ;;  %s561_s28 = scalar_lea.hbm %s780_s3, 48 }
 0x152   : > { %p558_p4 = scmp.ne.s32.totalorder %s735_s12, %s557_s25  ;;  %p562_p9 = scmp.lt.u32.totalorder %s735_s12, %s780_s3 }
 0x153   : > { %p563_p10 = scmp.lt.u32.totalorder %s561_s28, %s557_s25  ;;  %p565_p12 = scmp.lt.u32.totalorder %s557_s25, %s735_s12 }
 0x154   : > { %p559_p7 = pnand %p558_p4, %p669_p5 }
 0x155   : > { %p564_p11 = por %p563_p10, %p562_p9 }
 0x156   : > { %p560_p8 = pneg %p559_p7 }
 0x157   : > { %p566_p13 = por %p565_p12, %p564_p11 }
 0x159   : > { %p567_p0 = pnand %p566_p13, %p560_p8 }
 0x15b   : > { %570 = shalt.err (!%p567_p0)
}
 0x15c   : > { %497 = dma.vmem_to_hbm [thread:$0]  (%p669_p5), %s737_s9, 16, %s735_s12, %s320_s13  }
 0x15d PF: > { %p503_p1 = scmp.ge.s32.totalorder %s605_s17, 2  ;;  %s344_s4 = sand.u32 1, %s593_s14  }
 0x15e   : > { %s345_s5 = scalar_lea.sflag [#allocation4], %s344_s4 }
 0x15f   : > { %p500_p2 = pnand %p503_p1, %p673_p6 }
 0x161   : > { %588 = dma.done.wait (!%p500_p2), %s345_s5, 16  }
 0x162   : > { %590 = vsyncadd (!%p500_p2), %s345_s5, 4294967280  ;;  %p14_p3 = scmp.ge.s32.totalorder %s657_s19, 5   ;;  %s785_s14 = smov %s597_s15 }
 0x163   : > { %s786_s15 = smov %s601_s16  ;;  %s787_s16 = smov %s667_s22 }
 0x164   : > { %s788_s17 = smov %s657_s19  ;;  %16 = sbr.rel (!%p14_p3) target bundleno = 5 (0x5), region = 67 }
 0x16b   :  { %349 = vsyncpa [#allocation4], 1 }
 0x16c   :  { %351 = vsyncpa [#allocation4 + $0x1], 1 }

</bundles_post_ra>
